<compile_context>
chip_gen: v6e
topology: v6e:2x2x1
jax: 0.10.0
libtpu: 0.0.40
codegen_flags: <defaults>
</compile_context>

<pallas_src>
import jax
import jax.numpy as jnp
from jax.experimental import pallas as pl
from jax.experimental.pallas import tpu as pltpu


# ---------------------------------------------------------------------------
# Synthetic deterministic CPPN (stands in for cppn[1] / cppn[0]).
# ---------------------------------------------------------------------------
def cppn_weight(x_in, x_out, c_in, c_out, z):
    x_in = x_in.astype(jnp.float32)
    x_out = x_out.astype(jnp.float32)
    c_in = c_in.astype(jnp.float32)
    c_out = c_out.astype(jnp.float32)
    z = z.astype(jnp.float32)
    return (0.5 * jnp.sin(0.13 * x_in + 0.07 * x_out + 0.29 * c_in)
            * jnp.cos(0.05 * x_in - 0.11 * x_out + 0.17 * c_out)
            + 0.001 * z)


def cppn_bias(c_out):
    c_out = c_out.astype(jnp.float32)
    return 0.1 * jnp.sin(0.31 * c_out) + 0.01 * c_out / (1.0 + c_out)


def make_params(C_in, C_out, kernel_size, input_size, z=0):
    """Mirror of Conv1DCppnVar.__init__ parameter construction."""
    k = kernel_size
    out_len = input_size - k
    c_out = jnp.arange(C_out)
    c_in = jnp.arange(C_in)
    out = jnp.arange(out_len)
    in_ = jnp.arange(k)
    cc_out, cc_in, oo, kk = jnp.meshgrid(c_out, c_in, out, in_, indexing="ij")
    ii = kk + oo  # x_in coordinate = output position + tap index
    w = cppn_weight(ii, oo, cc_in, cc_out, jnp.full(ii.shape, z))   # (C_out, C_in, OUT, k)
    b = cppn_bias(c_out)                                            # (C_out,)
    return w, b


def prepare_params(w, b):
    """One-time re-layout (the torch module does this at __init__; hoisted out
    of the hot forward path per the perf review).

    w: (C_out, C_in, OUT, k) f32 -> (k*C_in, C_out, OUT) bf16, row index j*C_in+i
    b: (C_out,)             f32 -> (C_out, 1)           f32
    """
    C_out, C_in, OUT, k = w.shape
    w_p = jnp.transpose(w, (3, 1, 0, 2)).reshape(k * C_in, C_out, OUT)
    w_p = w_p.astype(jnp.bfloat16)
    b_p = b.reshape(C_out, 1).astype(jnp.float32)
    return w_p, b_p


# ---------------------------------------------------------------------------
# Pallas kernel.
#   xp_ref : (k*C_in*B, T_OUT)     bf16   pre-shifted taps, row (j*C_in+i)*B + b
#   w_ref  : (k*C_in, T_C, T_OUT)  bf16   row j*C_in+i, lane-dense over OUT
#   b_ref  : (T_C, 1)              f32
#   o_ref  : (B, T_C, T_OUT)       f32
# ---------------------------------------------------------------------------
def conv1d_cppn_var_kernel(xp_ref, w_ref, b_ref, o_ref):
    n_taps = w_ref.shape[0]          # k * C_in (small, static -> fully unrolled)
    B = o_ref.shape[0]

    acc = jnp.zeros(o_ref.shape, jnp.float32)          # (B, T_C, T_OUT) f32 accumulator
    for t in range(n_taps):
        # Aligned full-width loads; bf16*bf16 products are exact in f32.
        xt = xp_ref[t * B:(t + 1) * B, :].astype(jnp.float32)   # (B, T_OUT)
        wt = w_ref[t].astype(jnp.float32)                       # (T_C, T_OUT)
        acc = acc + xt[:, None, :] * wt[None, :, :]             # pure VPU FMA

    y = acc + b_ref[...][None, :, :]                            # bias over B and OUT
    o_ref[...] = jnp.maximum(y, 0.0).astype(o_ref.dtype)        # activation = relu (module default)


def conv1d_cppn_var_forward(x, w_p, b_p, *, tile_c=None, tile_out=None):
    """x: (B, C_in, IN) f32, w_p: (k*C_in, C_out, OUT) bf16, b_p: (C_out, 1) f32
    -> (B, C_out, OUT) f32."""
    B, C_in, IN = x.shape
    n_taps, C_out, OUT = w_p.shape
    assert n_taps % C_in == 0
    k = n_taps // C_in
    assert OUT == IN - k
    assert b_p.shape == (C_out, 1)

    # ---- tile selection ---------------------------------------------------
    if tile_c is None:
        # >= 2 "parallel" grid steps (v7x has 2 TensorCores) while keeping the
        # dominant bf16 w block unpadded (sublane multiple of 16) when possible.
        tile_c = C_out // 2 if (C_out % 32 == 0) else C_out
    assert C_out % tile_c == 0
    assert tile_c == C_out or tile_c % 8 == 0

    if tile_out is None:
        tile_out = OUT if OUT <= 512 else 512
    assert OUT % tile_out == 0
    assert tile_out == OUT or tile_out % 128 == 0

    # ---- lane-aligned per-tap patches for x (tiny vs w; duplication is free)
    x_bf = x.astype(jnp.bfloat16)
    taps = [x_bf[:, :, j:j + OUT] for j in range(k)]        # each (B, C_in, OUT)
    xp = jnp.stack(taps, axis=0)                            # (k, B, C_in, OUT)
    xp = jnp.transpose(xp, (0, 2, 1, 3)).reshape(k * C_in * B, OUT)

    grid = (C_out // tile_c, OUT // tile_out)

    # ---- explicit VMEM limit (v5e scoped default is 16 MiB; v7x physical 64)
    def _blk_bytes(shape, itemsize):
        sub = {4: 8, 2: 16, 1: 32}[itemsize]
        s = list(shape)
        s[-1] = -(-s[-1] // 128) * 128
        s[-2] = -(-s[-2] // sub) * sub
        n = 1
        for d in s:
            n *= d
        return n * itemsize

    needed = 2 * (_blk_bytes((k * C_in * B, tile_out), 2)
                  + _blk_bytes((n_taps, tile_c, tile_out), 2)
                  + _blk_bytes((tile_c, 1), 4)
                  + _blk_bytes((B, tile_c, tile_out), 4))
    vmem_limit = int(min(max(2 * needed, 16 * 1024 * 1024), 48 * 1024 * 1024))

    return pl.pallas_call(
        conv1d_cppn_var_kernel,
        out_shape=jax.ShapeDtypeStruct((B, C_out, OUT), jnp.float32),
        grid=grid,
        in_specs=[
            pl.BlockSpec((k * C_in * B, tile_out), lambda c, t: (0, t)),
            pl.BlockSpec((n_taps, tile_c, tile_out), lambda c, t: (0, c, t)),
            pl.BlockSpec((tile_c, 1), lambda c, t: (c, 0)),
        ],
        out_specs=pl.BlockSpec((B, tile_c, tile_out), lambda c, t: (0, c, t)),
        compiler_params=pltpu.CompilerParams(
            dimension_semantics=("parallel", "parallel"),
            vmem_limit_bytes=vmem_limit,
        ),
    )(xp, w_p, b_p)


# ---------------------------------------------------------------------------
# Pure-JAX reference (mirror of the torch forward) for correctness checking.
# ---------------------------------------------------------------------------
def reference_forward(x, w, b):
    B, C_in, IN = x.shape
    C_out, _, OUT, k = w.shape
    idxs = jnp.arange(OUT)[:, None] + jnp.arange(k)[None, :]    # idxs[o, j] = o + j
    patches = x[:, :, idxs]                                     # (B, C_in, OUT, k)
    y = jnp.einsum("biok,ciok->bco", patches, w) + b[None, :, None]
    return jnp.maximum(y, 0.0)


if __name__ == "__main__":
    batch = 4
    C_in = 4
    C_out = 32                            # -> tile_c=16, 2 "parallel" grid steps
    kernel_size = 3
    input_size = 131                      # OUT = 128 -> lane-dense output positions
    out_len = input_size - kernel_size

    w, b = make_params(C_in, C_out, kernel_size, input_size, z=0)
    w_p, b_p = prepare_params(w, b)       # one-time, hoisted out of the hot path

    key = jax.random.PRNGKey(0)
    x = jax.random.normal(key, (batch, C_in, input_size), dtype=jnp.float32)

    forward = jax.jit(conv1d_cppn_var_forward)
    out = jax.block_until_ready(forward(x, w_p, b_p))
    assert out.shape == (batch, C_out, out_len)

    # Compare against the reference fed the same bf16-quantized x/w (the kernel
    # streams bf16 but accumulates in f32), so the check stays tight.
    xq = x.astype(jnp.bfloat16).astype(jnp.float32)
    wq = w.astype(jnp.bfloat16).astype(jnp.float32)
    ref = reference_forward(xq, wq, b)
    max_err = float(jnp.max(jnp.abs(out - ref)))
    assert max_err < 1e-4, f"mismatch vs pure-JAX reference: {max_err}"

    print("KERNEL_OK")
</pallas_src>

<mosaic_0001>
module attributes {stable_mosaic.version = 11 : i64} {
  func.func @conv1d_cppn_var_kernel(%arg0: i32, %arg1: i32, %arg2: memref<48x128xbf16, #tpu.memory_space<vmem>>, %arg3: memref<12x16x128xbf16, #tpu.memory_space<vmem>>, %arg4: memref<16x1xf32, #tpu.memory_space<vmem>>, %arg5: memref<4x16x128xf32, #tpu.memory_space<vmem>>) attributes {dimension_semantics = [#tpu.dimension_semantics<parallel>, #tpu.dimension_semantics<parallel>], iteration_bounds = array<i64: 2, 1>, scalar_prefetch = 0 : i64, scratch_operands = 0 : i64, tpu.core_type = #tpu.core_type<tc>, window_params = [{transform_indices = @transform_0, window_bounds = array<i64: 48, 128>}, {transform_indices = @transform_1, window_bounds = array<i64: 12, 16, 128>}, {transform_indices = @transform_2, window_bounds = array<i64: 16, 1>}, {transform_indices = @transform_3, window_bounds = array<i64: 4, 16, 128>}]} {
    %cst = arith.constant 0.000000e+00 : f32
    %0 = vector.broadcast %cst : f32 to vector<4x16x128xf32>
    %c0 = arith.constant 0 : index
    %c0_0 = arith.constant 0 : index
    %1 = vector.load %arg2[%c0, %c0_0] : memref<48x128xbf16, #tpu.memory_space<vmem>>, vector<4x128xbf16>
    %2 = arith.extf %1 : vector<4x128xbf16> to vector<4x128xf32>
    %c0_1 = arith.constant 0 : index
    %c0_2 = arith.constant 0 : index
    %c0_3 = arith.constant 0 : index
    %3 = vector.load %arg3[%c0_1, %c0_2, %c0_3] : memref<12x16x128xbf16, #tpu.memory_space<vmem>>, vector<1x16x128xbf16>
    %4 = vector.shape_cast %3 : vector<1x16x128xbf16> to vector<16x128xbf16>
    %5 = arith.extf %4 : vector<16x128xbf16> to vector<16x128xf32>
    %6 = vector.shape_cast %2 : vector<4x128xf32> to vector<4x1x128xf32>
    %7 = vector.shape_cast %5 : vector<16x128xf32> to vector<1x16x128xf32>
    %8 = vector.broadcast %6 : vector<4x1x128xf32> to vector<4x16x128xf32>
    %9 = vector.broadcast %7 : vector<1x16x128xf32> to vector<4x16x128xf32>
    %10 = arith.mulf %8, %9 : vector<4x16x128xf32>
    %11 = arith.addf %0, %10 : vector<4x16x128xf32>
    %c4 = arith.constant 4 : index
    %c0_4 = arith.constant 0 : index
    %12 = vector.load %arg2[%c4, %c0_4] : memref<48x128xbf16, #tpu.memory_space<vmem>>, vector<4x128xbf16>
    %13 = arith.extf %12 : vector<4x128xbf16> to vector<4x128xf32>
    %c1 = arith.constant 1 : index
    %c0_5 = arith.constant 0 : index
    %c0_6 = arith.constant 0 : index
    %14 = vector.load %arg3[%c1, %c0_5, %c0_6] : memref<12x16x128xbf16, #tpu.memory_space<vmem>>, vector<1x16x128xbf16>
    %15 = vector.shape_cast %14 : vector<1x16x128xbf16> to vector<16x128xbf16>
    %16 = arith.extf %15 : vector<16x128xbf16> to vector<16x128xf32>
    %17 = vector.shape_cast %13 : vector<4x128xf32> to vector<4x1x128xf32>
    %18 = vector.shape_cast %16 : vector<16x128xf32> to vector<1x16x128xf32>
    %19 = vector.broadcast %17 : vector<4x1x128xf32> to vector<4x16x128xf32>
    %20 = vector.broadcast %18 : vector<1x16x128xf32> to vector<4x16x128xf32>
    %21 = arith.mulf %19, %20 : vector<4x16x128xf32>
    %22 = arith.addf %11, %21 : vector<4x16x128xf32>
    %c8 = arith.constant 8 : index
    %c0_7 = arith.constant 0 : index
    %23 = vector.load %arg2[%c8, %c0_7] : memref<48x128xbf16, #tpu.memory_space<vmem>>, vector<4x128xbf16>
    %24 = arith.extf %23 : vector<4x128xbf16> to vector<4x128xf32>
    %c2 = arith.constant 2 : index
    %c0_8 = arith.constant 0 : index
    %c0_9 = arith.constant 0 : index
    %25 = vector.load %arg3[%c2, %c0_8, %c0_9] : memref<12x16x128xbf16, #tpu.memory_space<vmem>>, vector<1x16x128xbf16>
    %26 = vector.shape_cast %25 : vector<1x16x128xbf16> to vector<16x128xbf16>
    %27 = arith.extf %26 : vector<16x128xbf16> to vector<16x128xf32>
    %28 = vector.shape_cast %24 : vector<4x128xf32> to vector<4x1x128xf32>
    %29 = vector.shape_cast %27 : vector<16x128xf32> to vector<1x16x128xf32>
    %30 = vector.broadcast %28 : vector<4x1x128xf32> to vector<4x16x128xf32>
    %31 = vector.broadcast %29 : vector<1x16x128xf32> to vector<4x16x128xf32>
    %32 = arith.mulf %30, %31 : vector<4x16x128xf32>
    %33 = arith.addf %22, %32 : vector<4x16x128xf32>
    %c12 = arith.constant 12 : index
    %c0_10 = arith.constant 0 : index
    %34 = vector.load %arg2[%c12, %c0_10] : memref<48x128xbf16, #tpu.memory_space<vmem>>, vector<4x128xbf16>
    %35 = arith.extf %34 : vector<4x128xbf16> to vector<4x128xf32>
    %c3 = arith.constant 3 : index
    %c0_11 = arith.constant 0 : index
    %c0_12 = arith.constant 0 : index
    %36 = vector.load %arg3[%c3, %c0_11, %c0_12] : memref<12x16x128xbf16, #tpu.memory_space<vmem>>, vector<1x16x128xbf16>
    %37 = vector.shape_cast %36 : vector<1x16x128xbf16> to vector<16x128xbf16>
    %38 = arith.extf %37 : vector<16x128xbf16> to vector<16x128xf32>
    %39 = vector.shape_cast %35 : vector<4x128xf32> to vector<4x1x128xf32>
    %40 = vector.shape_cast %38 : vector<16x128xf32> to vector<1x16x128xf32>
    %41 = vector.broadcast %39 : vector<4x1x128xf32> to vector<4x16x128xf32>
    %42 = vector.broadcast %40 : vector<1x16x128xf32> to vector<4x16x128xf32>
    %43 = arith.mulf %41, %42 : vector<4x16x128xf32>
    %44 = arith.addf %33, %43 : vector<4x16x128xf32>
    %c16 = arith.constant 16 : index
    %c0_13 = arith.constant 0 : index
    %45 = vector.load %arg2[%c16, %c0_13] : memref<48x128xbf16, #tpu.memory_space<vmem>>, vector<4x128xbf16>
    %46 = arith.extf %45 : vector<4x128xbf16> to vector<4x128xf32>
    %c4_14 = arith.constant 4 : index
    %c0_15 = arith.constant 0 : index
    %c0_16 = arith.constant 0 : index
    %47 = vector.load %arg3[%c4_14, %c0_15, %c0_16] : memref<12x16x128xbf16, #tpu.memory_space<vmem>>, vector<1x16x128xbf16>
    %48 = vector.shape_cast %47 : vector<1x16x128xbf16> to vector<16x128xbf16>
    %49 = arith.extf %48 : vector<16x128xbf16> to vector<16x128xf32>
    %50 = vector.shape_cast %46 : vector<4x128xf32> to vector<4x1x128xf32>
    %51 = vector.shape_cast %49 : vector<16x128xf32> to vector<1x16x128xf32>
    %52 = vector.broadcast %50 : vector<4x1x128xf32> to vector<4x16x128xf32>
    %53 = vector.broadcast %51 : vector<1x16x128xf32> to vector<4x16x128xf32>
    %54 = arith.mulf %52, %53 : vector<4x16x128xf32>
    %55 = arith.addf %44, %54 : vector<4x16x128xf32>
    %c20 = arith.constant 20 : index
    %c0_17 = arith.constant 0 : index
    %56 = vector.load %arg2[%c20, %c0_17] : memref<48x128xbf16, #tpu.memory_space<vmem>>, vector<4x128xbf16>
    %57 = arith.extf %56 : vector<4x128xbf16> to vector<4x128xf32>
    %c5 = arith.constant 5 : index
    %c0_18 = arith.constant 0 : index
    %c0_19 = arith.constant 0 : index
    %58 = vector.load %arg3[%c5, %c0_18, %c0_19] : memref<12x16x128xbf16, #tpu.memory_space<vmem>>, vector<1x16x128xbf16>
    %59 = vector.shape_cast %58 : vector<1x16x128xbf16> to vector<16x128xbf16>
    %60 = arith.extf %59 : vector<16x128xbf16> to vector<16x128xf32>
    %61 = vector.shape_cast %57 : vector<4x128xf32> to vector<4x1x128xf32>
    %62 = vector.shape_cast %60 : vector<16x128xf32> to vector<1x16x128xf32>
    %63 = vector.broadcast %61 : vector<4x1x128xf32> to vector<4x16x128xf32>
    %64 = vector.broadcast %62 : vector<1x16x128xf32> to vector<4x16x128xf32>
    %65 = arith.mulf %63, %64 : vector<4x16x128xf32>
    %66 = arith.addf %55, %65 : vector<4x16x128xf32>
    %c24 = arith.constant 24 : index
    %c0_20 = arith.constant 0 : index
    %67 = vector.load %arg2[%c24, %c0_20] : memref<48x128xbf16, #tpu.memory_space<vmem>>, vector<4x128xbf16>
    %68 = arith.extf %67 : vector<4x128xbf16> to vector<4x128xf32>
    %c6 = arith.constant 6 : index
    %c0_21 = arith.constant 0 : index
    %c0_22 = arith.constant 0 : index
    %69 = vector.load %arg3[%c6, %c0_21, %c0_22] : memref<12x16x128xbf16, #tpu.memory_space<vmem>>, vector<1x16x128xbf16>
    %70 = vector.shape_cast %69 : vector<1x16x128xbf16> to vector<16x128xbf16>
    %71 = arith.extf %70 : vector<16x128xbf16> to vector<16x128xf32>
    %72 = vector.shape_cast %68 : vector<4x128xf32> to vector<4x1x128xf32>
    %73 = vector.shape_cast %71 : vector<16x128xf32> to vector<1x16x128xf32>
    %74 = vector.broadcast %72 : vector<4x1x128xf32> to vector<4x16x128xf32>
    %75 = vector.broadcast %73 : vector<1x16x128xf32> to vector<4x16x128xf32>
    %76 = arith.mulf %74, %75 : vector<4x16x128xf32>
    %77 = arith.addf %66, %76 : vector<4x16x128xf32>
    %c28 = arith.constant 28 : index
    %c0_23 = arith.constant 0 : index
    %78 = vector.load %arg2[%c28, %c0_23] : memref<48x128xbf16, #tpu.memory_space<vmem>>, vector<4x128xbf16>
    %79 = arith.extf %78 : vector<4x128xbf16> to vector<4x128xf32>
    %c7 = arith.constant 7 : index
    %c0_24 = arith.constant 0 : index
    %c0_25 = arith.constant 0 : index
    %80 = vector.load %arg3[%c7, %c0_24, %c0_25] : memref<12x16x128xbf16, #tpu.memory_space<vmem>>, vector<1x16x128xbf16>
    %81 = vector.shape_cast %80 : vector<1x16x128xbf16> to vector<16x128xbf16>
    %82 = arith.extf %81 : vector<16x128xbf16> to vector<16x128xf32>
    %83 = vector.shape_cast %79 : vector<4x128xf32> to vector<4x1x128xf32>
    %84 = vector.shape_cast %82 : vector<16x128xf32> to vector<1x16x128xf32>
    %85 = vector.broadcast %83 : vector<4x1x128xf32> to vector<4x16x128xf32>
    %86 = vector.broadcast %84 : vector<1x16x128xf32> to vector<4x16x128xf32>
    %87 = arith.mulf %85, %86 : vector<4x16x128xf32>
    %88 = arith.addf %77, %87 : vector<4x16x128xf32>
    %c32 = arith.constant 32 : index
    %c0_26 = arith.constant 0 : index
    %89 = vector.load %arg2[%c32, %c0_26] : memref<48x128xbf16, #tpu.memory_space<vmem>>, vector<4x128xbf16>
    %90 = arith.extf %89 : vector<4x128xbf16> to vector<4x128xf32>
    %c8_27 = arith.constant 8 : index
    %c0_28 = arith.constant 0 : index
    %c0_29 = arith.constant 0 : index
    %91 = vector.load %arg3[%c8_27, %c0_28, %c0_29] : memref<12x16x128xbf16, #tpu.memory_space<vmem>>, vector<1x16x128xbf16>
    %92 = vector.shape_cast %91 : vector<1x16x128xbf16> to vector<16x128xbf16>
    %93 = arith.extf %92 : vector<16x128xbf16> to vector<16x128xf32>
    %94 = vector.shape_cast %90 : vector<4x128xf32> to vector<4x1x128xf32>
    %95 = vector.shape_cast %93 : vector<16x128xf32> to vector<1x16x128xf32>
    %96 = vector.broadcast %94 : vector<4x1x128xf32> to vector<4x16x128xf32>
    %97 = vector.broadcast %95 : vector<1x16x128xf32> to vector<4x16x128xf32>
    %98 = arith.mulf %96, %97 : vector<4x16x128xf32>
    %99 = arith.addf %88, %98 : vector<4x16x128xf32>
    %c36 = arith.constant 36 : index
    %c0_30 = arith.constant 0 : index
    %100 = vector.load %arg2[%c36, %c0_30] : memref<48x128xbf16, #tpu.memory_space<vmem>>, vector<4x128xbf16>
    %101 = arith.extf %100 : vector<4x128xbf16> to vector<4x128xf32>
    %c9 = arith.constant 9 : index
    %c0_31 = arith.constant 0 : index
    %c0_32 = arith.constant 0 : index
    %102 = vector.load %arg3[%c9, %c0_31, %c0_32] : memref<12x16x128xbf16, #tpu.memory_space<vmem>>, vector<1x16x128xbf16>
    %103 = vector.shape_cast %102 : vector<1x16x128xbf16> to vector<16x128xbf16>
    %104 = arith.extf %103 : vector<16x128xbf16> to vector<16x128xf32>
    %105 = vector.shape_cast %101 : vector<4x128xf32> to vector<4x1x128xf32>
    %106 = vector.shape_cast %104 : vector<16x128xf32> to vector<1x16x128xf32>
    %107 = vector.broadcast %105 : vector<4x1x128xf32> to vector<4x16x128xf32>
    %108 = vector.broadcast %106 : vector<1x16x128xf32> to vector<4x16x128xf32>
    %109 = arith.mulf %107, %108 : vector<4x16x128xf32>
    %110 = arith.addf %99, %109 : vector<4x16x128xf32>
    %c40 = arith.constant 40 : index
    %c0_33 = arith.constant 0 : index
    %111 = vector.load %arg2[%c40, %c0_33] : memref<48x128xbf16, #tpu.memory_space<vmem>>, vector<4x128xbf16>
    %112 = arith.extf %111 : vector<4x128xbf16> to vector<4x128xf32>
    %c10 = arith.constant 10 : index
    %c0_34 = arith.constant 0 : index
    %c0_35 = arith.constant 0 : index
    %113 = vector.load %arg3[%c10, %c0_34, %c0_35] : memref<12x16x128xbf16, #tpu.memory_space<vmem>>, vector<1x16x128xbf16>
    %114 = vector.shape_cast %113 : vector<1x16x128xbf16> to vector<16x128xbf16>
    %115 = arith.extf %114 : vector<16x128xbf16> to vector<16x128xf32>
    %116 = vector.shape_cast %112 : vector<4x128xf32> to vector<4x1x128xf32>
    %117 = vector.shape_cast %115 : vector<16x128xf32> to vector<1x16x128xf32>
    %118 = vector.broadcast %116 : vector<4x1x128xf32> to vector<4x16x128xf32>
    %119 = vector.broadcast %117 : vector<1x16x128xf32> to vector<4x16x128xf32>
    %120 = arith.mulf %118, %119 : vector<4x16x128xf32>
    %121 = arith.addf %110, %120 : vector<4x16x128xf32>
    %c44 = arith.constant 44 : index
    %c0_36 = arith.constant 0 : index
    %122 = vector.load %arg2[%c44, %c0_36] : memref<48x128xbf16, #tpu.memory_space<vmem>>, vector<4x128xbf16>
    %123 = arith.extf %122 : vector<4x128xbf16> to vector<4x128xf32>
    %c11 = arith.constant 11 : index
    %c0_37 = arith.constant 0 : index
    %c0_38 = arith.constant 0 : index
    %124 = vector.load %arg3[%c11, %c0_37, %c0_38] : memref<12x16x128xbf16, #tpu.memory_space<vmem>>, vector<1x16x128xbf16>
    %125 = vector.shape_cast %124 : vector<1x16x128xbf16> to vector<16x128xbf16>
    %126 = arith.extf %125 : vector<16x128xbf16> to vector<16x128xf32>
    %127 = vector.shape_cast %123 : vector<4x128xf32> to vector<4x1x128xf32>
    %128 = vector.shape_cast %126 : vector<16x128xf32> to vector<1x16x128xf32>
    %129 = vector.broadcast %127 : vector<4x1x128xf32> to vector<4x16x128xf32>
    %130 = vector.broadcast %128 : vector<1x16x128xf32> to vector<4x16x128xf32>
    %131 = arith.mulf %129, %130 : vector<4x16x128xf32>
    %132 = arith.addf %121, %131 : vector<4x16x128xf32>
    %c0_39 = arith.constant 0 : index
    %c0_40 = arith.constant 0 : index
    %133 = vector.load %arg4[%c0_39, %c0_40] : memref<16x1xf32, #tpu.memory_space<vmem>>, vector<16x1xf32>
    %134 = vector.shape_cast %133 : vector<16x1xf32> to vector<1x16x1xf32>
    %135 = vector.broadcast %134 : vector<1x16x1xf32> to vector<4x16x128xf32>
    %136 = arith.addf %132, %135 : vector<4x16x128xf32>
    %cst_41 = arith.constant 0.000000e+00 : f32
    %137 = vector.broadcast %cst_41 : f32 to vector<4x16x128xf32>
    %138 = arith.maximumf %136, %137 : vector<4x16x128xf32>
    %c0_42 = arith.constant 0 : index
    %c0_43 = arith.constant 0 : index
    %c0_44 = arith.constant 0 : index
    %139 = vector.load %arg5[%c0_42, %c0_43, %c0_44] : memref<4x16x128xf32, #tpu.memory_space<vmem>>, vector<4x16x128xf32>
    tpu.vector_store %arg5[%c0_42, %c0_43, %c0_44], %138 {strides = array<i32>} : memref<4x16x128xf32, #tpu.memory_space<vmem>>, vector<4x16x128xf32>,
    return
  }
  func.func @transform_0(%arg0: i32, %arg1: i32) -> (i32, i32) {
    %c0_i32 = arith.constant 0 : i32
    %c0_i32_0 = arith.constant 0 : i32
    return %c0_i32, %arg1 : i32, i32
  }
  func.func @transform_1(%arg0: i32, %arg1: i32) -> (i32, i32, i32) {
    %c0_i32 = arith.constant 0 : i32
    %c0_i32_0 = arith.constant 0 : i32
    return %c0_i32, %arg0, %arg1 : i32, i32, i32
  }
  func.func @transform_2(%arg0: i32, %arg1: i32) -> (i32, i32) {
    %c0_i32 = arith.constant 0 : i32
    %c0_i32_0 = arith.constant 0 : i32
    return %arg0, %c0_i32 : i32, i32
  }
  func.func @transform_3(%arg0: i32, %arg1: i32) -> (i32, i32, i32) {
    %c0_i32 = arith.constant 0 : i32
    %c0_i32_0 = arith.constant 0 : i32
    return %c0_i32, %arg0, %arg1 : i32, i32, i32
  }
}

</mosaic_0001>

<bundles_post_ra>
// kernel: conv1d_cppn_var_forward.1
= control target key start
LH: loop header
LB: loop body
LE: loop exit
PB: predicated region body
PF: predicated region fallthrough
CT: control target
= control target key end

     0   :  { %8 = vsyncpa [#allocation4], 0  ;;  %s1972_s0 = inlined_call_operand.vmem [shape: bf16[48,128], index: 0, kind: input, shape index: {}]   ;;  %s1973_s1 = inlined_call_operand.vmem [shape: bf16[12,32,128], index: 1, kind: input, shape index: {}]   ;;  %s1974_s2 = inlined_call_operand.vmem [shape: f32[32,1], index: 2, kind: input, shape index: {}]   ;;  %s1975_s3 = inlined_call_operand.hbm [shape: f32[4,32,128], index: 3, kind: output, shape index: {}]  }
   0x1   :  { %10 = vsyncpa [#allocation4 + $0x1], 0  ;;  %s1618_s12 = smov 0   ;;  %s1620_s13 = smov 0  }
   0x2   :  { %s1622_s14 = smov 0   ;;  %s1624_s15 = smov 0  }
   0x3   :  { %s1626_s16 = smov 0   ;;  %s1628_s17 = smov 0  }
   0x4 LB: > { %s1365_s18 = sadd.s32 4294967295, %s1587_s17   ;;  %s1366_s19 = sadd.s32 4294967294, %s1587_s17   ;;  %s1587_s17 = sphi %s1628_s17, %s16_s17   ;;  %s1583_s16 = sphi %s1626_s16, %s1982_s16   ;;  %s1579_s15 = sphi %s1624_s15, %s1981_s15   ;;  %s1575_s14 = sphi %s1622_s14, %s1980_s14   ;;  %s1571_s13 = sphi %s1620_s13, %s1979_s13   ;;  %s1567_s12 = sphi %s1618_s12, %s1978_s12  }
   0x5   : > { %s28_s20 = sadd.s32 1, %s1583_s16  ;;  %s63_s21 = sadd.s32 1, %s1575_s14 }
   0x6   : > { %p30_p0 = scmp.ge.s32.totalorder %s28_s20, 2  ;;  %p70_p1 = scmp.ne.s32.totalorder %s1575_s14, %s1571_s13 }
   0x7   : > { %p71_p2 = scmp.eq.s32.totalorder %s1587_s17, 0  ;;  %p128_p3 = scmp.eq.s32.totalorder %s1365_s18, 1 }
   0x8   : > { %s1984_s20 = smov (%p30_p0, %s28_s20), 0  ;;  %p133_p6 = scmp.ne.s32.totalorder %s1571_s13, %s1567_s12 }
   0x9   : > { %p72_p4 = por %p71_p2, %p70_p1  ;;  %p1657_p5 = por %p128_p3, %p70_p1 }
   0xa   : > { %s58_s23 = ssub.s32 %s1583_s16, %s1984_s20  ;;  %p134_p8 = scmp.eq.s32.totalorder %s1366_s19, 1 }
   0xb   : > { %p61_p7 = scmp.eq.s32.totalorder %s58_s23, 0  ;;  %p1369_p10 = scmp.ge.s32.totalorder %s1587_s17, 2 }
   0xc   : > { %p1668_p9 = por %p134_p8, %p133_p6 }
   0xd   : > { %s1666_s24 = scalar_select %p61_p7, %s1575_s14, %s63_s21  }
   0xe   : > { %157 = sbr.rel (%p1369_p10) target bundleno = 29 (0x1d), region = 20 }
  0x13   : > { %160 = sbr.rel (!%p72_p4) target bundleno = 29 (0x1d), region = 24  ;;  %s162_s26 = sand.u32 (%p72_p4), 1, %s1575_s14  }
  0x14   : > { %s1403_s27 = sshll.u32 (%p72_p4), %s1583_s16, 3  ;;  %s1464_s28 = smul.u32 (%p72_p4), 96, %s162_s26 }
  0x15   : > { %s168_s4 = scalar_lea.vmem (%p72_p4), %s1973_s1, %s1403_s27 }
  0x16   : > { %v185_v0 = vld [vmem:[%s168_s4] sm:$0xff] (%p72_p4)   ;;  %v189_v1 = vld [vmem:[%s168_s4 + $0x10] sm:$0xff] (%p72_p4)   ;;  %s164_s5 = scalar_lea.vmem (%p72_p4), [#allocation2], %s1464_s28 }
  0x17   : > { %v193_v2 = vld [vmem:[%s168_s4 + $0x20] sm:$0xff] (%p72_p4)   ;;  %v197_v3 = vld [vmem:[%s168_s4 + $0x30] sm:$0xff] (%p72_p4)   ;;  %186 = vst [vmem:[%s164_s5] sm:$0xff] (%p72_p4), %v185_v0   ;;  %190 = vst [vmem:[%s164_s5 + $0x8] sm:$0xff] (%p72_p4), %v189_v1  }
  0x18   : > { %v201_v4 = vld [vmem:[%s168_s4 + $0x40] sm:$0xff]   ;;  %v205_v5 = vld [vmem:[%s168_s4 + $0x50] sm:$0xff]   ;;  %194 = vst [vmem:[%s164_s5 + $0x10] sm:$0xff] %v193_v2   ;;  %198 = vst [vmem:[%s164_s5 + $0x18] sm:$0xff] %v197_v3  }
  0x19   : > { %202 = vst [vmem:[%s164_s5 + $0x20] sm:$0xff] %v201_v4   ;;  %206 = vst [vmem:[%s164_s5 + $0x28] sm:$0xff] %v205_v5   ;;  %v209_v6 = vld [vmem:[%s168_s4 + $0x60] sm:$0xff]   ;;  %v213_v7 = vld [vmem:[%s168_s4 + $0x70] sm:$0xff]  }
  0x1a   : > { %v217_v8 = vld [vmem:[%s168_s4 + $0x80] sm:$0xff]   ;;  %210 = vst [vmem:[%s164_s5 + $0x30] sm:$0xff] %v209_v6   ;;  %214 = vst [vmem:[%s164_s5 + $0x38] sm:$0xff] %v213_v7   ;;  %v221_v9 = vld [vmem:[%s168_s4 + $0x90] sm:$0xff]  }
  0x1b   : > { %218 = vst [vmem:[%s164_s5 + $0x40] sm:$0xff] %v217_v8   ;;  %v225_v10 = vld [vmem:[%s168_s4 + $0xa0] sm:$0xff]   ;;  %v229_v11 = vld [vmem:[%s168_s4 + $0xb0] sm:$0xff]   ;;  %222 = vst [vmem:[%s164_s5 + $0x48] sm:$0xff] %v221_v9  }
  0x1c   : > { %226 = vst [vmem:[%s164_s5 + $0x50] sm:$0xff] %v225_v10   ;;  %230 = vst [vmem:[%s164_s5 + $0x58] sm:$0xff] %v229_v11  }
  0x1d PF: > { %p1372_p11 = scmp.ge.s32.totalorder %s1587_s17, 1  ;;  %p312_p12 = scmp.lt.s32.totalorder %s1587_s17, 3 }
  0x1f   : > { %p313_p13 = pnand %p1372_p11, %p312_p12 }
  0x20   : > { %s1374_s6 = sshll.u32 (!%p313_p13), %s1579_s15, 1  ;;  %s1687_s11 = sand.u32 (!%p313_p13), 1, %s1571_s13  }
  0x21   : > { %316 = sbr.rel (%p313_p13) target bundleno = 185 (0xb9), region = 69  ;;  %p357_p0 = scmp.lt.s32.totalorder (!%p313_p13), %s1374_s6, 3 }
  0x22   : > { %s1465_s26 = smul.u32 (!%p313_p13), 96, %s1687_s11  ;;  %s1373_s5 = sshll.u32 (!%p313_p13), %s1687_s11, 6 }
  0x26   : > { %v1589_v12 = vmov 0   ;;  %s1986_s6 = smov (!%p357_p0, %s1374_s6), 3  ;;  %v1590_v15 = vmov 1966171168   ;;  %v373_v17 = vlaneseq  ;;  %v430_v18 = vld [vmem:[%s1972_s0] sm:$0xc] }
  0x27   : > { %1536 = vset.pattern.permute.xlu0 %v1589_v12  ;;  %s1375_s7 = sshll.u32 %s1986_s6, 3  ;;  %v371_v16 = vunpack.c.l.s4 %v1590_v15  ;;  %v431_v21 = vunpack.c.l.bf16 %v430_v18  ;;  %v363_v22 = vld [vmem:[%s1972_s0] sm:$0x3]  ;;  %v499_v28 = vld [vmem:[%s1972_s0 + $0x4] sm:$0x3]  ;;  %s350_s6 = scalar_lea.vmem [#allocation3], %s1373_s5 }
  0x28   : > { %s360_s10 = scalar_lea.vmem %s1974_s2, %s1375_s7  ;;  %v374_v20 = vshrl.u32 %v373_v17, 7  ;;  %v364_v23 = vunpack.c.l.bf16 %v363_v22  ;;  %v567_v29 = vld [vmem:[%s1972_s0 + $0x4] sm:$0xc]  ;;  %v500_v30 = vunpack.c.l.bf16 %v499_v28  ;;  %v636_v34 = vld [vmem:[%s1972_s0 + $0x8] sm:$0x3]  ;;  %s1221_s7 = scalar_lea.sflag [#allocation4], %s1687_s11 }
  0x29   : > { %v1184_v13 = vld [vmem:[%s360_s10] sm:$0xff]  ;;  %v1185_v14 = vld [vmem:[%s360_s10 + $0x8] sm:$0xff]  ;;  %v372_v19 = vunpack.c.0.s8 %v371_v16  ;;  %v438_v25 = vcombine.high %v431_v21, %v431_v21  ;;  %v568_v31 = vunpack.c.l.bf16 %v567_v29  ;;  %s1719_s10 = scalar_lea.vmem [#allocation2], %s1465_s26  ;;  %v637_v46 = vunpack.c.l.bf16 %v636_v34 }
  0x2a   : > { %1188 = vperm.xlu0 %1536, %v1184_v13   ;;  %v1712_v35 = vld [vmem:[%s1972_s0 + $0x8] sm:$0xc]  ;;  %v1717_v36 = vld [vmem:[%s1972_s0 + $0xc] sm:$0x3]  ;;  %v1406_v37 = vld [vmem:[%s1719_s10] sm:$0xff]   ;;  %v1723_v39 = vsub.s32 0, %v374_v20 }
  0x2b   : > { %v1695_v24 = vsub.s32 %v372_v19, %v374_v20  ;;  %v1453_v40 = vld [vmem:[%s1719_s10 + $0x8] sm:$0xff]   ;;  %v1454_v43 = vld [vmem:[%s1719_s10 + $0x10] sm:$0xff]   ;;  %v575_v45 = vcombine.high %v568_v31, %v568_v31  ;;  %v1455_v49 = vld [vmem:[%s1719_s10 + $0x18] sm:$0xff]   ;;  %v705_v50 = vunpack.c.l.bf16 %v1712_v35  ;;  %v774_v51 = vunpack.c.l.bf16 %v1717_v36 }
  0x2c   : > { %v1729_v41 = vld [vmem:[%s1972_s0 + $0xc] sm:$0xc]  ;;  %v1407_v52 = vunpack.c.l.bf16 %v1406_v37  ;;  %v1408_v53 = vunpack.c.h.bf16 %v1406_v37  ;;  %v1411_v54 = vunpack.c.l.bf16 %v1453_v40  ;;  %v1412_v57 = vunpack.c.h.bf16 %v1453_v40  ;;  %v1456_v60 = vld [vmem:[%s1719_s10 + $0x20] sm:$0xff]  }
  0x2d   : > { %v376_v26 = vrot.slane %v364_v23, %v1695_v24  ;;  %v445_v27 = vrot.slane %v438_v25, %v1695_v24  ;;  %v513_v44 = vrot.slane %v500_v30, %v1695_v24  ;;  %v842_v55 = vunpack.c.l.bf16 %v1729_v41 }
  0x2e   : > { %1193 = vperm.xlu0 %1536, %v1185_v14   ;;  %v1740_v58 = vunpack.c.l.bf16 %v1454_v43  ;;  %v1742_v59 = vunpack.c.h.bf16 %v1454_v43  ;;  %v1745_v63 = vunpack.c.l.bf16 %v1455_v49  ;;  %v582_v0 = vrot.slane %v575_v45, %v1695_v24 }
  0x2f   : > { %v377_v32 = vcombine.high %v376_v26, %v376_v26  ;;  %v446_v33 = vcombine.high %v445_v27, %v445_v27  ;;  %v384_v38 = vrot.slane %v376_v26, %v1695_v24  ;;  %v453_v42 = vrot.slane %v445_v27, %v1695_v24 }
  0x30   : > { %v514_v62 = vcombine.high %v513_v44, %v513_v44  ;;  %v521_v4 = vrot.slane %v513_v44, %v1695_v24  ;;  %v1752_v7 = vunpack.c.h.bf16 %v1455_v49  ;;  %v1754_v8 = vunpack.c.l.bf16 %v1456_v60 }
  0x31   : > { %v391_v47 = vrot.slane %v377_v32, %v1695_v24  ;;  %v460_v48 = vrot.slane %v446_v33, %v1695_v24  ;;  %v392_v56 = vcombine.high %v384_v38, %v384_v38  ;;  %v461_v61 = vcombine.high %v453_v42, %v453_v42 }
  0x32   : > { %v397_v2 = vrot.slane %v384_v38, %v1723_v39  ;;  %v466_v6 = vrot.slane %v453_v42, %v1723_v39  ;;  %v1758_v11 = vunpack.c.h.bf16 %v1456_v60  ;;  %v650_v12 = vrot.slane %v637_v46, %v1695_v24 }
  0x33   : > { %v393_v1 = vcombine.high %v391_v47, %v391_v47  ;;  %v462_v3 = vcombine.high %v460_v48, %v460_v48  ;;  %v401_v5 = vrot.slane %v391_v47, %v1723_v39  ;;  %v405_v9 = vrot.slane %v392_v56, %v1723_v39 }
  0x34   : > { %v470_v10 = vrot.slane %v460_v48, %v1723_v39  ;;  %v474_v13 = vrot.slane %v461_v61, %v1723_v39  ;;  %v528_v14 = vrot.slane %v514_v62, %v1695_v24  ;;  %v583_v15 = vcombine.high %v582_v0, %v582_v0 }
  0x35   : > { %v590_v16 = vrot.slane %v582_v0, %v1695_v24  ;;  %v409_v17 = vrot.slane %v393_v1, %v1723_v39  ;;  %v414_v18 = vmul.f32 %v1407_v52, %v397_v2  ;;  %v478_v19 = vrot.slane %v462_v3, %v1723_v39 }
  0x36   : > { %v529_v20 = vcombine.high %v521_v4, %v521_v4  ;;  %v415_v21 = vmul.f32 %v1408_v53, %v397_v2  ;;  %v416_v22 = vmul.f32 %v1407_v52, %v401_v5  ;;  %v417_v23 = vmul.f32 %v1408_v53, %v401_v5 }
  0x37   : > { %v483_v25 = vmul.f32 %v1411_v54, %v466_v6  ;;  %v418_v26 = vmul.f32 %v1407_v52, %v405_v9  ;;  %v484_v27 = vmul.f32 %v1412_v57, %v466_v6  ;;  %v485_v28 = vmul.f32 %v1411_v54, %v470_v10 }
  0x38   : > { %v486_v29 = vmul.f32 %v1412_v57, %v470_v10  ;;  %v419_v30 = vmul.f32 %v1408_v53, %v405_v9  ;;  %v487_v31 = vmul.f32 %v1411_v54, %v474_v13  ;;  %v488_v32 = vmul.f32 %v1412_v57, %v474_v13 }
  0x39   : > { %v530_v33 = vcombine.high %v528_v14, %v528_v14  ;;  %v420_v34 = vmul.f32 %v1407_v52, %v409_v17  ;;  %v421_v37 = vmul.f32 %v1408_v53, %v409_v17  ;;  %v489_v38 = vmul.f32 %v1411_v54, %v478_v19 }
  0x3a   : > { %v534_v40 = vrot.slane %v521_v4, %v1723_v39  ;;  %v490_v42 = vmul.f32 %v1412_v57, %v478_v19  ;;  %v491_v43 = vadd.f32 %v483_v25, %v414_v18  ;;  %v538_v44 = vrot.slane %v528_v14, %v1723_v39 }
  0x3b   : > { %v597_v45 = vrot.slane %v583_v15, %v1695_v24  ;;  %v492_v46 = vadd.f32 %v484_v27, %v415_v21  ;;  %v493_v47 = vadd.f32 %v485_v28, %v416_v22  ;;  %v494_v48 = vadd.f32 %v486_v29, %v417_v23 }
  0x3c   : > { %v542_v49 = vrot.slane %v529_v20, %v1723_v39  ;;  %v495_v56 = vadd.f32 %v487_v31, %v418_v26  ;;  %v496_v60 = vadd.f32 %v488_v32, %v419_v30  ;;  %v546_v61 = vrot.slane %v530_v33, %v1723_v39 }
  0x3d   : > { %v598_v52 = vcombine.high %v590_v16, %v590_v16  ;;  %v497_v53 = vadd.f32 %v489_v38, %v420_v34  ;;  %v551_v54 = vmul.f32 %v1740_v58, %v534_v40  ;;  %v651_v62 = vcombine.high %v650_v12, %v650_v12 }
  0x3e   : > { %v712_v57 = vcombine.high %v705_v50, %v705_v50  ;;  %v552_v0 = vmul.f32 %v1742_v59, %v534_v40  ;;  %v553_v1 = vmul.f32 %v1740_v58, %v538_v44  ;;  %v554_v2 = vmul.f32 %v1742_v59, %v538_v44  ;;  %v1457_v44 = vld [vmem:[%s1719_s10 + $0x28] sm:$0xff]  }
  0x3f   : > { %v599_v3 = vcombine.high %v597_v45, %v597_v45  ;;  %v498_v4 = vadd.f32 %v490_v42, %v421_v37  ;;  %v555_v5 = vmul.f32 %v1740_v58, %v542_v49  ;;  %v603_v6 = vrot.slane %v590_v16, %v1723_v39 }
  0x40   : > { %v607_v9 = vrot.slane %v597_v45, %v1723_v39  ;;  %v556_v10 = vmul.f32 %v1742_v59, %v542_v49  ;;  %v557_v35 = vmul.f32 %v1740_v58, %v546_v61  ;;  %v558_v50 = vmul.f32 %v1742_v59, %v546_v61 }
  0x41   : > { %v611_v13 = vrot.slane %v598_v52, %v1723_v39  ;;  %v559_v14 = vadd.f32 %v551_v54, %v491_v43  ;;  %v658_v15 = vrot.slane %v650_v12, %v1695_v24  ;;  %v665_v17 = vrot.slane %v651_v62, %v1695_v24 }
  0x42   : > { %v719_v18 = vrot.slane %v712_v57, %v1695_v24  ;;  %v560_v19 = vadd.f32 %v552_v0, %v492_v46  ;;  %v561_v20 = vadd.f32 %v553_v1, %v493_v47  ;;  %v562_v16 = vadd.f32 %v554_v2, %v494_v48  ;;  %v1458_v48 = vld [vmem:[%s1719_s10 + $0x30] sm:$0xff]  }
  0x43   : > { %v615_v21 = vrot.slane %v599_v3, %v1723_v39  ;;  %v563_v22 = vadd.f32 %v555_v5, %v495_v56  ;;  %v620_v23 = vmul.f32 %v1745_v63, %v603_v6  ;;  %v621_v58 = vmul.f32 %v1752_v7, %v603_v6 }
  0x44   : > { %v622_v59 = vmul.f32 %v1745_v63, %v607_v9  ;;  %v564_v25 = vadd.f32 %v556_v10, %v496_v60  ;;  %v565_v26 = vadd.f32 %v557_v35, %v497_v53  ;;  %v623_v12 = vmul.f32 %v1752_v7, %v607_v9 }
  0x45   : > { %v624_v27 = vmul.f32 %v1745_v63, %v611_v13  ;;  %v625_v28 = vmul.f32 %v1752_v7, %v611_v13  ;;  %v666_v29 = vcombine.high %v658_v15, %v658_v15  ;;  %v667_v30 = vcombine.high %v665_v17, %v665_v17 }
  0x46   : > { %v720_v31 = vcombine.high %v719_v18, %v719_v18  ;;  %v566_v32 = vadd.f32 %v558_v50, %v498_v4  ;;  %v626_v33 = vmul.f32 %v1745_v63, %v615_v21  ;;  %v627_v34 = vmul.f32 %v1752_v7, %v615_v21 }
  0x47   : > { %v671_v37 = vrot.slane %v658_v15, %v1723_v39  ;;  %v628_v38 = vadd.f32 %v620_v23, %v559_v14  ;;  %v629_v40 = vadd.f32 %v621_v58, %v560_v19  ;;  %v630_v42 = vadd.f32 %v622_v59, %v561_v20  ;;  %v910_v23 = vld [vmem:[%s1972_s0 + $0x10] sm:$0x3] }
  0x48   : > { %v675_v43 = vrot.slane %v665_v17, %v1723_v39  ;;  %v631_v45 = vadd.f32 %v623_v12, %v562_v16  ;;  %v632_v46 = vadd.f32 %v624_v27, %v563_v22  ;;  %v727_v47 = vrot.slane %v719_v18, %v1695_v24  ;;  %v1459_v17 = vld [vmem:[%s1719_s10 + $0x38] sm:$0xff]   ;;  %v978_v12 = vld [vmem:[%s1972_s0 + $0x10] sm:$0xc] }
  0x49   : > { %v787_v49 = vrot.slane %v774_v51, %v1695_v24  ;;  %v633_v63 = vadd.f32 %v625_v28, %v564_v25  ;;  %v679_v7 = vrot.slane %v666_v29, %v1723_v39  ;;  %v683_v56 = vrot.slane %v667_v30, %v1723_v39 }
  0x4a   : > { %v734_v60 = vrot.slane %v720_v31, %v1695_v24  ;;  %v634_v61 = vadd.f32 %v626_v33, %v565_v26  ;;  %v635_v52 = vadd.f32 %v627_v34, %v566_v32  ;;  %v688_v53 = vmul.f32 %v1754_v8, %v671_v37 }
  0x4b   : > { %v1427_v54 = vunpack.c.l.bf16 %v1457_v44  ;;  %v689_v62 = vmul.f32 %v1758_v11, %v671_v37  ;;  %v690_v57 = vmul.f32 %v1754_v8, %v675_v43  ;;  %v1428_v0 = vunpack.c.h.bf16 %v1457_v44 }
  0x4c   : > { %v1811_v1 = vunpack.c.l.bf16 %v1458_v48  ;;  %v691_v36 = vmul.f32 %v1758_v11, %v675_v43  ;;  %v735_v51 = vcombine.high %v727_v47, %v727_v47  ;;  %v788_v2 = vcombine.high %v787_v49, %v787_v49 }
  0x4d   : > { %v849_v3 = vcombine.high %v842_v55, %v842_v55  ;;  %v692_v4 = vmul.f32 %v1754_v8, %v679_v7  ;;  %v693_v5 = vmul.f32 %v1758_v11, %v679_v7  ;;  %v694_v6 = vmul.f32 %v1754_v8, %v683_v56  ;;  %v1460_v7 = vld [vmem:[%s1719_s10 + $0x40] sm:$0xff]  }
  0x4e   : > { %v736_v9 = vcombine.high %v734_v60, %v734_v60  ;;  %v695_v10 = vmul.f32 %v1758_v11, %v683_v56  ;;  %v696_v35 = vadd.f32 %v688_v53, %v628_v38  ;;  %v740_v50 = vrot.slane %v727_v47, %v1723_v39 }
  0x4f   : > { %v1822_v13 = vunpack.c.h.bf16 %v1458_v48  ;;  %v697_v14 = vadd.f32 %v689_v62, %v629_v40  ;;  %v698_v15 = vadd.f32 %v690_v57, %v630_v42  ;;  %v744_v41 = vrot.slane %v734_v60, %v1723_v39 }
  0x50   : > { %v795_v55 = vrot.slane %v787_v49, %v1695_v24  ;;  %v699_v18 = vadd.f32 %v691_v36, %v631_v45  ;;  %v748_v19 = vrot.slane %v735_v51, %v1723_v39  ;;  %v802_v8 = vrot.slane %v788_v2, %v1695_v24 }
  0x51   : > { %v856_v20 = vrot.slane %v849_v3, %v1695_v24  ;;  %v700_v11 = vadd.f32 %v692_v4, %v632_v46  ;;  %v701_v16 = vadd.f32 %v693_v5, %v633_v63  ;;  %v702_v21 = vadd.f32 %v694_v6, %v634_v61 }
  0x52   : > { %v752_v22 = vrot.slane %v736_v9, %v1723_v39  ;;  %v703_v58 = vadd.f32 %v695_v10, %v635_v52  ;;  %v757_v59 = vmul.f32 %v1427_v54, %v740_v50  ;;  %v758_v25 = vmul.f32 %v1428_v0, %v740_v50  ;;  %v1047_v9 = vld [vmem:[%s1972_s0 + $0x14] sm:$0x3] }
  0x53   : > { %v1834_v26 = vunpack.c.l.bf16 %v1459_v17  ;;  %v759_v27 = vmul.f32 %v1427_v54, %v744_v41  ;;  %v760_v28 = vmul.f32 %v1428_v0, %v744_v41  ;;  %v803_v29 = vcombine.high %v795_v55, %v795_v55 }
  0x54   : > { %v1839_v30 = vunpack.c.h.bf16 %v1459_v17  ;;  %v761_v31 = vmul.f32 %v1427_v54, %v748_v19  ;;  %v804_v32 = vcombine.high %v802_v8, %v802_v8  ;;  %v857_v33 = vcombine.high %v856_v20, %v856_v20 }
  0x55   : > { %v911_v34 = vunpack.c.l.bf16 %v910_v23  ;;  %v762_v37 = vmul.f32 %v1428_v0, %v748_v19  ;;  %v763_v38 = vmul.f32 %v1427_v54, %v752_v22  ;;  %v808_v40 = vrot.slane %v795_v55, %v1723_v39 }
  0x56   : > { %v979_v42 = vunpack.c.l.bf16 %v978_v12  ;;  %v764_v43 = vmul.f32 %v1428_v0, %v752_v22  ;;  %v765_v44 = vadd.f32 %v757_v59, %v696_v35  ;;  %v766_v45 = vadd.f32 %v758_v25, %v697_v14  ;;  %v1461_v22 = vld [vmem:[%s1719_s10 + $0x48] sm:$0xff]  }
  0x57   : > { %v812_v46 = vrot.slane %v802_v8, %v1723_v39  ;;  %v767_v47 = vadd.f32 %v759_v27, %v698_v15  ;;  %v768_v48 = vadd.f32 %v760_v28, %v699_v18  ;;  %v816_v49 = vrot.slane %v803_v29, %v1723_v39  ;;  %v1115_v15 = vld [vmem:[%s1972_s0 + $0x14] sm:$0xc] }
  0x58   : > { %v864_v63 = vrot.slane %v856_v20, %v1695_v24  ;;  %v769_v56 = vadd.f32 %v761_v31, %v700_v11  ;;  %v820_v60 = vrot.slane %v804_v32, %v1723_v39  ;;  %v871_v61 = vrot.slane %v857_v33, %v1695_v24 }
  0x59   : > { %v924_v52 = vrot.slane %v911_v34, %v1695_v24  ;;  %v770_v53 = vadd.f32 %v762_v37, %v701_v16  ;;  %v771_v54 = vadd.f32 %v763_v38, %v702_v21  ;;  %v825_v62 = vmul.f32 %v1811_v1, %v808_v40 }
  0x5a   : > { %v986_v57 = vcombine.high %v979_v42, %v979_v42  ;;  %v772_v0 = vadd.f32 %v764_v43, %v703_v58  ;;  %v826_v36 = vmul.f32 %v1822_v13, %v808_v40  ;;  %v827_v51 = vmul.f32 %v1811_v1, %v812_v46 }
  0x5b   : > { %v1852_v2 = vunpack.c.l.bf16 %v1460_v7  ;;  %v828_v3 = vmul.f32 %v1822_v13, %v812_v46  ;;  %v829_v4 = vmul.f32 %v1811_v1, %v816_v49  ;;  %v872_v5 = vcombine.high %v864_v63, %v864_v63 }
  0x5c   : > { %v1856_v6 = vunpack.c.h.bf16 %v1460_v7  ;;  %v830_v10 = vmul.f32 %v1822_v13, %v816_v49  ;;  %v831_v35 = vmul.f32 %v1811_v1, %v820_v60  ;;  %v873_v50 = vcombine.high %v871_v61, %v871_v61 }
  0x5d   : > { %v925_v14 = vcombine.high %v924_v52, %v924_v52  ;;  %v832_v41 = vmul.f32 %v1822_v13, %v820_v60  ;;  %v833_v55 = vadd.f32 %v825_v62, %v765_v44  ;;  %v877_v17 = vrot.slane %v864_v63, %v1723_v39 }
  0x5e   : > { %v993_v18 = vrot.slane %v986_v57, %v1695_v24  ;;  %v834_v19 = vadd.f32 %v826_v36, %v766_v45  ;;  %v835_v8 = vadd.f32 %v827_v51, %v767_v47  ;;  %v881_v20 = vrot.slane %v871_v61, %v1723_v39  ;;  %v1462_v61 = vld [vmem:[%s1719_s10 + $0x50] sm:$0xff]  }
  0x5f   : > { %v1048_v11 = vunpack.c.l.bf16 %v1047_v9  ;;  %v836_v16 = vadd.f32 %v828_v3, %v768_v48  ;;  %v837_v1 = vadd.f32 %v829_v4, %v769_v56  ;;  %v885_v21 = vrot.slane %v872_v5, %v1723_v39 }
  0x60   : > { %v1116_v23 = vunpack.c.l.bf16 %v1115_v15  ;;  %v838_v58 = vadd.f32 %v830_v10, %v770_v53  ;;  %v889_v59 = vrot.slane %v873_v50, %v1723_v39  ;;  %v932_v13 = vrot.slane %v924_v52, %v1695_v24 }
  0x61   : > { %v939_v25 = vrot.slane %v925_v14, %v1695_v24  ;;  %v839_v12 = vadd.f32 %v831_v35, %v771_v54  ;;  %v840_v27 = vadd.f32 %v832_v41, %v772_v0  ;;  %v894_v28 = vmul.f32 %v1834_v26, %v877_v17 }
  0x62   : > { %v994_v29 = vcombine.high %v993_v18, %v993_v18  ;;  %v895_v31 = vmul.f32 %v1839_v30, %v877_v17  ;;  %v896_v32 = vmul.f32 %v1834_v26, %v881_v20  ;;  %v1878_v33 = vunpack.c.l.bf16 %v1461_v22 }
  0x63   : > { %v1061_v34 = vrot.slane %v1048_v11, %v1695_v24  ;;  %v897_v37 = vmul.f32 %v1839_v30, %v881_v20  ;;  %v898_v38 = vmul.f32 %v1834_v26, %v885_v21  ;;  %v1883_v40 = vunpack.c.h.bf16 %v1461_v22 }
  0x64   : > { %v1123_v42 = vcombine.high %v1116_v23, %v1116_v23  ;;  %v899_v43 = vmul.f32 %v1839_v30, %v885_v21  ;;  %v900_v44 = vmul.f32 %v1834_v26, %v889_v59  ;;  %v940_v45 = vcombine.high %v932_v13, %v932_v13 }
  0x65   : > { %v941_v46 = vcombine.high %v939_v25, %v939_v25  ;;  %v901_v47 = vmul.f32 %v1839_v30, %v889_v59  ;;  %v902_v48 = vadd.f32 %v894_v28, %v833_v55  ;;  %v1001_v49 = vrot.slane %v993_v18, %v1695_v24 }
  0x66   : > { %v1008_v63 = vrot.slane %v994_v29, %v1695_v24  ;;  %v903_v7 = vadd.f32 %v895_v31, %v834_v19  ;;  %v904_v56 = vadd.f32 %v896_v32, %v835_v8  ;;  %v945_v60 = vrot.slane %v932_v13, %v1723_v39  ;;  %v1463_v29 = vld [vmem:[%s1719_s10 + $0x58] sm:$0xff]  }
  0x67   : > { %v1062_v52 = vcombine.high %v1061_v34, %v1061_v34  ;;  %v905_v53 = vadd.f32 %v897_v37, %v836_v16  ;;  %v906_v54 = vadd.f32 %v898_v38, %v837_v1  ;;  %v949_v62 = vrot.slane %v939_v25, %v1723_v39 }
  0x68   : > { %v1130_v26 = vrot.slane %v1123_v42, %v1695_v24  ;;  %v907_v57 = vadd.f32 %v899_v43, %v838_v58  ;;  %v908_v0 = vadd.f32 %v900_v44, %v839_v12  ;;  %v953_v30 = vrot.slane %v940_v45, %v1723_v39 }
  0x69   : > { %v957_v36 = vrot.slane %v941_v46, %v1723_v39  ;;  %v909_v51 = vadd.f32 %v901_v47, %v840_v27  ;;  %v1009_v3 = vcombine.high %v1001_v49, %v1001_v49  ;;  %v1010_v4 = vcombine.high %v1008_v63, %v1008_v63 }
  0x6a   : > { %v1447_v5 = vunpack.c.l.bf16 %v1462_v61  ;;  %v962_v9 = vmul.f32 %v1852_v2, %v945_v60  ;;  %v963_v10 = vmul.f32 %v1856_v6, %v945_v60  ;;  %v1069_v35 = vrot.slane %v1061_v34, %v1695_v24 }
  0x6b   : > { %v1076_v50 = vrot.slane %v1062_v52, %v1695_v24  ;;  %v964_v14 = vmul.f32 %v1852_v2, %v949_v62  ;;  %v965_v15 = vmul.f32 %v1856_v6, %v949_v62  ;;  %v1448_v41 = vunpack.c.h.bf16 %v1462_v61 }
  0x6c   : > { %v1131_v55 = vcombine.high %v1130_v26, %v1130_v26  ;;  %v966_v17 = vmul.f32 %v1852_v2, %v953_v30  ;;  %v967_v18 = vmul.f32 %v1856_v6, %v953_v30  ;;  %v968_v19 = vmul.f32 %v1852_v2, %v957_v36 }
  0x6d   : > { %v969_v8 = vmul.f32 %v1856_v6, %v957_v36  ;;  %v1014_v20 = vrot.slane %v1001_v49, %v1723_v39  ;;  %v1018_v11 = vrot.slane %v1008_v63, %v1723_v39  ;;  %v1022_v16 = vrot.slane %v1009_v3, %v1723_v39 }
  0x6e   : > { %v1026_v1 = vrot.slane %v1010_v4, %v1723_v39  ;;  %v970_v21 = vadd.f32 %v962_v9, %v902_v48  ;;  %v971_v22 = vadd.f32 %v963_v10, %v903_v7  ;;  %v1077_v23 = vcombine.high %v1069_v35, %v1069_v35 }
  0x6f   : > { %v1078_v58 = vcombine.high %v1076_v50, %v1076_v50  ;;  %v972_v59 = vadd.f32 %v964_v14, %v904_v56  ;;  %v973_v13 = vadd.f32 %v965_v15, %v905_v53  ;;  %v1138_v25 = vrot.slane %v1130_v26, %v1695_v24 }
  0x70   : > { %v1145_v2 = vrot.slane %v1131_v55, %v1695_v24  ;;  %v974_v6 = vadd.f32 %v966_v17, %v906_v54  ;;  %v975_v12 = vadd.f32 %v967_v18, %v907_v57  ;;  %v976_v27 = vadd.f32 %v968_v19, %v908_v0 }
  0x71   : > { %v977_v28 = vadd.f32 %v969_v8, %v909_v51  ;;  %v1031_v31 = vmul.f32 %v1878_v33, %v1014_v20  ;;  %v1033_v32 = vmul.f32 %v1878_v33, %v1018_v11  ;;  %v1035_v34 = vmul.f32 %v1878_v33, %v1022_v16 }
  0x72   : > { %v1037_v37 = vmul.f32 %v1878_v33, %v1026_v1  ;;  %v1082_v38 = vrot.slane %v1069_v35, %v1723_v39  ;;  %v1086_v42 = vrot.slane %v1076_v50, %v1723_v39  ;;  %v1090_v43 = vrot.slane %v1077_v23, %v1723_v39 }
  0x73   : > { %v1094_v24 = vrot.slane %v1078_v58, %v1723_v39  ;;  %v1451_v44 = vunpack.c.l.bf16 %v1463_v29  ;;  %v1452_v45 = vunpack.c.h.bf16 %v1463_v29  ;;  %v1146_v46 = vcombine.high %v1138_v25, %v1138_v25 }
  0x74   : > { %v1147_v47 = vcombine.high %v1145_v2, %v1145_v2  ;;  %v1032_v48 = vmul.f32 %v1883_v40, %v1014_v20  ;;  %v1034_v49 = vmul.f32 %v1883_v40, %v1018_v11  ;;  %v1036_v63 = vmul.f32 %v1883_v40, %v1022_v16 }
  0x75   : > { %v1038_v33 = vmul.f32 %v1883_v40, %v1026_v1  ;;  %v1039_v7 = vadd.f32 %v1031_v31, %v970_v21  ;;  %v1041_v56 = vadd.f32 %v1033_v32, %v972_v59  ;;  %v1043_v60 = vadd.f32 %v1035_v34, %v974_v6 }
  0x76   : > { %v1045_v61 = vadd.f32 %v1037_v37, %v976_v27  ;;  %v1099_v52 = vmul.f32 %v1447_v5, %v1082_v38  ;;  %v1101_v53 = vmul.f32 %v1447_v5, %v1086_v42  ;;  %v1103_v54 = vmul.f32 %v1447_v5, %v1090_v43 }
  0x77   : > { %v1105_v62 = vmul.f32 %v1447_v5, %v1094_v24  ;;  %v1151_v26 = vrot.slane %v1138_v25, %v1723_v39  ;;  %v1155_v57 = vrot.slane %v1145_v2, %v1723_v39  ;;  %v1159_v0 = vrot.slane %v1146_v46, %v1723_v39 }
  0x78   : > { %v1163_v30 = vrot.slane %v1147_v47, %v1723_v39  ;;  %v1040_v36 = vadd.f32 %v1032_v48, %v971_v22  ;;  %v1042_v51 = vadd.f32 %v1034_v49, %v973_v13  ;;  %v1044_v3 = vadd.f32 %v1036_v63, %v975_v12 }
  0x79   : > { %v1046_v40 = vadd.f32 %v1038_v33, %v977_v28  ;;  %v1100_v4 = vmul.f32 %v1448_v41, %v1082_v38  ;;  %v1102_v9 = vmul.f32 %v1448_v41, %v1086_v42  ;;  %v1104_v10 = vmul.f32 %v1448_v41, %v1090_v43 }
  0x7a   : > { %v1106_v35 = vmul.f32 %v1448_v41, %v1094_v24  ;;  %v1107_v50 = vadd.f32 %v1099_v52, %v1039_v7  ;;  %v1109_v14 = vadd.f32 %v1101_v53, %v1041_v56  ;;  %v1111_v15 = vadd.f32 %v1103_v54, %v1043_v60 }
  0x7b   : > { %v1113_v5 = vadd.f32 %v1105_v62, %v1045_v61  ;;  %v1168_v55 = vmul.f32 %v1451_v44, %v1151_v26  ;;  %v1170_v17 = vmul.f32 %v1451_v44, %v1155_v57  ;;  %v1172_v18 = vmul.f32 %v1451_v44, %v1159_v0 }
  0x7c   : > { %v1174_v19 = vmul.f32 %v1451_v44, %v1163_v30  ;;  %v1108_v8 = vadd.f32 %v1100_v4, %v1040_v36  ;;  %v1110_v20 = vadd.f32 %v1102_v9, %v1042_v51  ;;  %v1112_v39 = vadd.f32 %v1104_v10, %v1044_v3 }
  0x7d   : > { %v1114_v11 = vadd.f32 %v1106_v35, %v1046_v40  ;;  %v1169_v16 = vmul.f32 %v1452_v45, %v1151_v26  ;;  %v1171_v1 = vmul.f32 %v1452_v45, %v1155_v57  ;;  %v1173_v21 = vmul.f32 %v1452_v45, %v1159_v0 }
  0x7e   : > { %v1175_v22 = vmul.f32 %v1452_v45, %v1163_v30  ;;  %v1176_v23 = vadd.f32 %v1168_v55, %v1107_v50  ;;  %v1178_v58 = vadd.f32 %v1170_v17, %v1109_v14  ;;  %v1180_v41 = vadd.f32 %v1172_v18, %v1111_v15 }
  0x7f   : > { %v1182_v59 = vadd.f32 %v1174_v19, %v1113_v5  ;;  %v1177_v25 = vadd.f32 %v1169_v16, %v1108_v8  ;;  %v1179_v2 = vadd.f32 %v1171_v1, %v1110_v20  ;;  %v1181_v6 = vadd.f32 %v1173_v21, %v1112_v39 }
  0x80   : > { %v1183_v12 = vadd.f32 %v1175_v22, %v1114_v11 }
  0xa5   : > { %v1189_v13 = vpop.permute.xlu0 %1188 }
  0xa6   : > { %v1196_v27 = vadd.f32 %v1189_v13, %v1176_v23  ;;  %v1198_v28 = vadd.f32 %v1189_v13, %v1178_v58  ;;  %v1200_v29 = vadd.f32 %v1189_v13, %v1180_v41  ;;  %v1202_v31 = vadd.f32 %v1189_v13, %v1182_v59 }
  0xa8   : > { %v1204_v32 = vmax.f32 %v1196_v27, 0.0  ;;  %v1206_v34 = vmax.f32 %v1198_v28, 0.0  ;;  %v1208_v37 = vmax.f32 %v1200_v29, 0.0  ;;  %v1210_v38 = vmax.f32 %v1202_v31, 0.0 }
  0xa9   : > { %v1194_v42 = vpop.permute.xlu0 %1193 }
  0xaa   : > { %v1197_v43 = vadd.f32 %v1194_v42, %v1177_v25  ;;  %v1199_v24 = vadd.f32 %v1194_v42, %v1179_v2  ;;  %v1201_v44 = vadd.f32 %v1194_v42, %v1181_v6  ;;  %v1203_v45 = vadd.f32 %v1194_v42, %v1183_v12  ;;  %1212 = vst [vmem:[%s350_s6] sm:$0xff] %v1204_v32 }
  0xab   : > { %1214 = vst [vmem:[%s350_s6 + $0x10] sm:$0xff] %v1206_v34  ;;  %1216 = vst [vmem:[%s350_s6 + $0x20] sm:$0xff] %v1208_v37 }
  0xac   : > { %1218 = vst [vmem:[%s350_s6 + $0x30] sm:$0xff] %v1210_v38  ;;  %v1205_v46 = vmax.f32 %v1197_v43, 0.0  ;;  %v1207_v47 = vmax.f32 %v1199_v24, 0.0  ;;  %v1209_v48 = vmax.f32 %v1201_v44, 0.0  ;;  %v1211_v49 = vmax.f32 %v1203_v45, 0.0 }
  0xae   : > { %1213 = vst [vmem:[%s350_s6 + $0x8] sm:$0xff] %v1205_v46  ;;  %1215 = vst [vmem:[%s350_s6 + $0x18] sm:$0xff] %v1207_v47 }
  0xaf   : > { %1217 = vst [vmem:[%s350_s6 + $0x28] sm:$0xff] %v1209_v48  ;;  %1219 = vst [vmem:[%s350_s6 + $0x38] sm:$0xff] %v1211_v49 }
  0xb0   : > { %s1404_s8 = sshll.u32 %s1579_s15, 8  ;;  %s1245_s9 = sshll.u32 %s350_s6, 4  ;;  %s1246_s9 = int_to_ptr.vmem [resolvable:$true] %s1245_s9 }
  0xb1   : > { %s1234_s19 = scalar_lea.hbm %s1975_s3, %s1404_s8  ;;  %s1591_s21 = smov 256  }
  0xb2   : > { %1466 = sst [smem:[#allocation6]] (%p1657_p5), %s1591_s21  ;;  %s1592_s23 = smov 512  }
  0xb3   : > { %1467 = sst [smem:[#allocation6 + $0x1]] (%p1657_p5), %s1592_s23  ;;  %s1593_s11 = smov 2  }
  0xb4   : > { %1468 = sst [smem:[#allocation6 + $0x2]] (%p1657_p5), %s1593_s11  ;;  %s1594_s26 = smov 128  }
  0xb5   : > { %1469 = sst [smem:[#allocation6 + $0x3]] (%p1657_p5), %s1594_s26  ;;  %s1595_s15 = smov 8  }
  0xb6   : > { %1470 = sst [smem:[#allocation6 + $0x4]] (%p1657_p5), %s1594_s26  ;;  %s1596_s27 = smov 131072  }
  0xb7   : > { %1471 = sst [smem:[#allocation6 + $0x5]] (%p1657_p5), %s1595_s15  ;;  %s1597_s28 = smov 0  }
  0xb8   : > { %1472 = dma.general (%p1657_p5), %s1246_s9, 1024, %s1234_s19, %s1221_s7, %s1596_s27, [#allocation6], %s1597_s28, 0  }
  0xb9 PF: > { %s1273_s29 = sand.u32 1, %s1567_s12   ;;  %p1475_p1 = pnand %p1369_p10, %p1668_p9 }
  0xba   : > { %s1274_s30 = scalar_lea.sflag [#allocation4], %s1273_s29 }
  0xbb   : > { %p1476_p2 = pneg %p1475_p1 }
  0xbd   : > { %1562 = dma.done.wait (%p1476_p2), %s1274_s30, 1024  }
  0xbe   : > { %1564 = vsyncadd (%p1476_p2), %s1274_s30, 4294966272  ;;  %s16_s17 = sadd.s32 1, %s1587_s17   ;;  %s1978_s12 = smov %s1571_s13 }
  0xbf   : > { %p13_p3 = scmp.ge.s32.totalorder %s16_s17, 4   ;;  %s1979_s13 = smov %s1575_s14 }
  0xc0   : > { %s1980_s14 = smov %s1666_s24  ;;  %s1981_s15 = smov %s1583_s16 }
  0xc1   : > { %s1982_s16 = smov %s1984_s20  ;;  %15 = sbr.rel (!%p13_p3) target bundleno = 4 (0x4), region = 135 }
  0xc6   :  { %1279 = vsyncpa [#allocation4], 1 }
  0xc7   :  { %1281 = vsyncpa [#allocation4 + $0x1], 1 }

</bundles_post_ra>
